<compile_context>
chip_gen: v5e
topology: v5e:2x2
jax: 0.10.0
libtpu: 0.0.40
codegen_flags: <defaults>
</compile_context>

<pallas_src>
import jax
import jax.numpy as jnp
from jax.experimental import pallas as pl
from jax.experimental.pallas import tpu as pltpu

_TILE_BYTES_TARGET = 4 * 1024 * 1024   # ~4 MiB per block; 2x(in+out) ~= 16 MiB VMEM
_VMEM_LIMIT_BYTES = 32 * 1024 * 1024   # safe scoped limit on v5e / v6e / v7x


def _make_meanshift_kernel(scale, bias, apply_scale):
    """Kernel over one (1, 3, TH, W) block of one image.

    `scale` / `bias` are length-3 tuples of Python floats (trace-time
    constants), so each channel is a scalar mul+add (pure add when std == 1).
    """

    def kernel(x_ref, o_ref):
        for c in range(3):                      # static unroll; C folded in block
            xv = x_ref[0, c, :, :]
            if apply_scale:                     # trace-time flag (std != 1)
                xv = xv * scale[c]
            o_ref[0, c, :, :] = (xv + bias[c]).astype(o_ref.dtype)

    return kernel


def mean_shift(x, rgb_range=255, sign=-1, data_type="DIV2K", tile_rows=None):
    """x: [N, 3, H, W] array. Returns conv2d(x, eye(3)/std, bias) per the spec."""
    if data_type == "DIV2K":
        rgb_mean = (0.4488, 0.4371, 0.404)
    elif data_type == "DF2K":
        rgb_mean = (0.469, 0.449, 0.4036)
    else:
        raise NotImplementedError(f"Unknown data type for MeanShift: {data_type}.")
    rgb_std = (1.0, 1.0, 1.0)

    scale = tuple(1.0 / s for s in rgb_std)
    bias = tuple(float(sign) * rgb_range * m / s for m, s in zip(rgb_mean, rgb_std))
    apply_scale = any(s != 1.0 for s in rgb_std)

    # PyTorch conv2d yields float; promote integer images to f32 at the boundary.
    if not jnp.issubdtype(x.dtype, jnp.floating):
        x = x.astype(jnp.float32)

    N, C, H, W = x.shape
    assert C == 3, "MeanShift expects 3 input channels"

    # --- tiling: block = (1, 3, TH, W) -----------------------------------------
    # W == full last dim (lane axis) -> legal for any W, no padding needed.
    # TH: multiple of 8 sized for ~4 MiB blocks, or full H for small images.
    itemsize = jnp.dtype(x.dtype).itemsize
    if tile_rows is not None:
        th = int(tile_rows)
    else:
        th = _TILE_BYTES_TARGET // max(1, 3 * W * itemsize)
        th = max(8, (th // 8) * 8)
    if th >= H:
        th = H                                   # block == full dim (always legal)
    num_h_tiles = pl.cdiv(H, th)                 # ragged final block is masked

    blk = (1, 3, th, W)
    idx_map = lambda t, n: (n, 0, t, 0)          # big spatial axis leads the grid

    out = pl.pallas_call(
        _make_meanshift_kernel(scale, bias, apply_scale),
        out_shape=jax.ShapeDtypeStruct((N, C, H, W), x.dtype),
        grid=(num_h_tiles, N),
        in_specs=[pl.BlockSpec(blk, idx_map)],
        out_specs=pl.BlockSpec(blk, idx_map),
        compiler_params=pltpu.CompilerParams(
            dimension_semantics=("parallel", "parallel"),
            vmem_limit_bytes=_VMEM_LIMIT_BYTES),
    )(x)
    return out


if __name__ == "__main__":
    rgb_range = 255

    # Test 1: DIV2K, sign=-1, f32, W not a multiple of 128 (full-W lane block).
    N, C, H, W = 2, 3, 16, 16
    x = jax.random.uniform(jax.random.PRNGKey(0), (N, C, H, W),
                           dtype=jnp.float32) * rgb_range
    y = jax.block_until_ready(
        mean_shift(x, rgb_range=rgb_range, sign=-1, data_type="DIV2K"))
    rgb_mean = jnp.asarray((0.4488, 0.4371, 0.404), dtype=jnp.float32)
    ref = x + (-1 * rgb_range * rgb_mean).reshape(1, 3, 1, 1)
    assert y.shape == (N, C, H, W)
    assert jnp.allclose(y, ref, atol=1e-4, rtol=1e-5)

    # Test 2: DF2K, sign=+1, ragged H tiling (force TH=8 so H=20 -> 3 blocks,
    # the last one masked by Pallas).
    x2 = jax.random.uniform(jax.random.PRNGKey(1), (1, 3, 20, 24),
                            dtype=jnp.float32) * rgb_range
    y2 = jax.block_until_ready(
        mean_shift(x2, rgb_range=rgb_range, sign=1, data_type="DF2K",
                   tile_rows=8))
    mean2 = jnp.asarray((0.469, 0.449, 0.4036), dtype=jnp.float32)
    ref2 = x2 + (rgb_range * mean2).reshape(1, 3, 1, 1)
    assert y2.shape == x2.shape
    assert jnp.allclose(y2, ref2, atol=1e-4, rtol=1e-5)

    print("KERNEL_OK")
</pallas_src>

<mosaic_0001>
module attributes {stable_mosaic.version = 11 : i64} {
  func.func @kernel(%arg0: i32, %arg1: i32, %arg2: memref<1x3x16x16xf32, #tpu.memory_space<vmem>>, %arg3: memref<1x3x16x16xf32, #tpu.memory_space<vmem>>) attributes {dimension_semantics = [#tpu.dimension_semantics<parallel>, #tpu.dimension_semantics<parallel>], iteration_bounds = array<i64: 1, 2>, scalar_prefetch = 0 : i64, scratch_operands = 0 : i64, tpu.core_type = #tpu.core_type<tc>, window_params = [{transform_indices = @transform_0, window_bounds = array<i64: 1, 3, 16, 16>}, {transform_indices = @transform_1, window_bounds = array<i64: 1, 3, 16, 16>}]} {
    %c0 = arith.constant 0 : index
    %c0_0 = arith.constant 0 : index
    %c0_1 = arith.constant 0 : index
    %c0_2 = arith.constant 0 : index
    %0 = vector.load %arg2[%c0, %c0_0, %c0_1, %c0_2] : memref<1x3x16x16xf32, #tpu.memory_space<vmem>>, vector<1x1x16x16xf32>
    %1 = vector.shape_cast %0 : vector<1x1x16x16xf32> to vector<16x16xf32>
    %cst = arith.constant -1.144440e+02 : f32
    %2 = vector.broadcast %cst : f32 to vector<16x16xf32>
    %3 = arith.addf %1, %2 : vector<16x16xf32>
    %c0_3 = arith.constant 0 : index
    %c0_4 = arith.constant 0 : index
    %c0_5 = arith.constant 0 : index
    %c0_6 = arith.constant 0 : index
    %4 = vector.load %arg3[%c0_3, %c0_4, %c0_5, %c0_6] : memref<1x3x16x16xf32, #tpu.memory_space<vmem>>, vector<1x1x16x16xf32>
    %5 = vector.shape_cast %4 : vector<1x1x16x16xf32> to vector<16x16xf32>
    %6 = vector.shape_cast %3 : vector<16x16xf32> to vector<1x1x16x16xf32>
    tpu.vector_store %arg3[%c0_3, %c0_4, %c0_5, %c0_6], %6 {strides = array<i32>} : memref<1x3x16x16xf32, #tpu.memory_space<vmem>>, vector<1x1x16x16xf32>,
    %c0_7 = arith.constant 0 : index
    %c1 = arith.constant 1 : index
    %c0_8 = arith.constant 0 : index
    %c0_9 = arith.constant 0 : index
    %7 = vector.load %arg2[%c0_7, %c1, %c0_8, %c0_9] : memref<1x3x16x16xf32, #tpu.memory_space<vmem>>, vector<1x1x16x16xf32>
    %8 = vector.shape_cast %7 : vector<1x1x16x16xf32> to vector<16x16xf32>
    %cst_10 = arith.constant -111.460503 : f32
    %9 = vector.broadcast %cst_10 : f32 to vector<16x16xf32>
    %10 = arith.addf %8, %9 : vector<16x16xf32>
    %c0_11 = arith.constant 0 : index
    %c1_12 = arith.constant 1 : index
    %c0_13 = arith.constant 0 : index
    %c0_14 = arith.constant 0 : index
    %11 = vector.load %arg3[%c0_11, %c1_12, %c0_13, %c0_14] : memref<1x3x16x16xf32, #tpu.memory_space<vmem>>, vector<1x1x16x16xf32>
    %12 = vector.shape_cast %11 : vector<1x1x16x16xf32> to vector<16x16xf32>
    %13 = vector.shape_cast %10 : vector<16x16xf32> to vector<1x1x16x16xf32>
    tpu.vector_store %arg3[%c0_11, %c1_12, %c0_13, %c0_14], %13 {strides = array<i32>} : memref<1x3x16x16xf32, #tpu.memory_space<vmem>>, vector<1x1x16x16xf32>,
    %c0_15 = arith.constant 0 : index
    %c2 = arith.constant 2 : index
    %c0_16 = arith.constant 0 : index
    %c0_17 = arith.constant 0 : index
    %14 = vector.load %arg2[%c0_15, %c2, %c0_16, %c0_17] : memref<1x3x16x16xf32, #tpu.memory_space<vmem>>, vector<1x1x16x16xf32>
    %15 = vector.shape_cast %14 : vector<1x1x16x16xf32> to vector<16x16xf32>
    %cst_18 = arith.constant -1.030200e+02 : f32
    %16 = vector.broadcast %cst_18 : f32 to vector<16x16xf32>
    %17 = arith.addf %15, %16 : vector<16x16xf32>
    %c0_19 = arith.constant 0 : index
    %c2_20 = arith.constant 2 : index
    %c0_21 = arith.constant 0 : index
    %c0_22 = arith.constant 0 : index
    %18 = vector.load %arg3[%c0_19, %c2_20, %c0_21, %c0_22] : memref<1x3x16x16xf32, #tpu.memory_space<vmem>>, vector<1x1x16x16xf32>
    %19 = vector.shape_cast %18 : vector<1x1x16x16xf32> to vector<16x16xf32>
    %20 = vector.shape_cast %17 : vector<16x16xf32> to vector<1x1x16x16xf32>
    tpu.vector_store %arg3[%c0_19, %c2_20, %c0_21, %c0_22], %20 {strides = array<i32>} : memref<1x3x16x16xf32, #tpu.memory_space<vmem>>, vector<1x1x16x16xf32>,
    return
  }
  func.func @transform_0(%arg0: i32, %arg1: i32) -> (i32, i32, i32, i32) {
    %c0_i32 = arith.constant 0 : i32
    %c0_i32_0 = arith.constant 0 : i32
    %c0_i32_1 = arith.constant 0 : i32
    return %arg1, %c0_i32, %arg0, %c0_i32_0 : i32, i32, i32, i32
  }
  func.func @transform_1(%arg0: i32, %arg1: i32) -> (i32, i32, i32, i32) {
    %c0_i32 = arith.constant 0 : i32
    %c0_i32_0 = arith.constant 0 : i32
    %c0_i32_1 = arith.constant 0 : i32
    return %arg1, %c0_i32, %arg0, %c0_i32_0 : i32, i32, i32, i32
  }
}

</mosaic_0001>

<bundles_post_ra>
// kernel: tpu_custom_call.1
= control target key start
LH: loop header
LB: loop body
LE: loop exit
PB: predicated region body
PF: predicated region fallthrough
CT: control target
= control target key end

     0   :  { %6 = vsyncpa [#allocation3], 0  ;;  %s626_s0 = inlined_call_operand.hbm [shape: f32[2,3,16,16], index: 0, kind: input, shape index: {}]   ;;  %s627_s1 = inlined_call_operand.hbm [shape: f32[2,3,16,16], index: 1, kind: output, shape index: {}]  }
   0x1   :  { %8 = vsyncpa [#allocation3 + $0x1], 0 }
   0x2   :  { %9 = vsyncpa [#allocation4], 0 }
   0x3   :  { %11 = vsyncpa [#allocation4 + $0x1], 0  ;;  %s500_s6 = smov 0   ;;  %s502_s7 = smov 0  }
   0x4   :  { %s504_s8 = smov 0   ;;  %s506_s9 = smov 0  }
   0x5   :  { %s508_s10 = smov 0   ;;  %s510_s11 = smov 0  }
   0x6 LB: > { %s285_s12 = sadd.s32 4294967295, %s484_s11   ;;  %s286_s13 = sadd.s32 4294967294, %s484_s11   ;;  %s484_s11 = sphi %s510_s11, %s17_s11   ;;  %s480_s10 = sphi %s508_s10, %s636_s10   ;;  %s476_s9 = sphi %s506_s9, %s635_s9   ;;  %s472_s8 = sphi %s504_s8, %s634_s8   ;;  %s468_s7 = sphi %s502_s7, %s633_s7   ;;  %s464_s6 = sphi %s500_s6, %s632_s6  }
   0x7   : > { %s26_s14 = sadd.s32 1, %s480_s10  ;;  %s38_s15 = sadd.s32 1, %s472_s8 }
   0x8   : > { %p27_p0 = scmp.ge.s32.totalorder %s26_s14, 2  ;;  %p45_p1 = scmp.ne.s32.totalorder %s472_s8, %s468_s7 }
   0x9   : > { %p46_p2 = scmp.eq.s32.totalorder %s484_s11, 0  ;;  %p51_p3 = scmp.ne.s32.totalorder %s468_s7, %s464_s6 }
   0xa   : > { %s638_s14 = smov (%p27_p0, %s26_s14), 0  ;;  %p52_p5 = scmp.eq.s32.totalorder %s285_s12, 0 }
   0xb   : > { %p541_p4 = por %p46_p2, %p45_p1  ;;  %s33_s17 = ssub.s32 %s480_s10, %s638_s14 }
   0xc   : > { %p77_p6 = scmp.eq.s32.totalorder %s285_s12, 1  ;;  %p36_p7 = scmp.eq.s32.totalorder %s33_s17, 0 }
   0xd   : > { %p547_p8 = por %p52_p5, %p51_p3  ;;  %p83_p10 = scmp.eq.s32.totalorder %s286_s13, 1 }
   0xe   : > { %p551_p9 = por %p77_p6, %p45_p1  ;;  %p288_p12 = scmp.ge.s32.totalorder %s484_s11, 2 }
   0xf   : > { %s556_s20 = scalar_select %p36_p7, %s472_s8, %s38_s15  }
  0x10   : > { %p558_p11 = por %p83_p10, %p51_p3  ;;  %p318_p13 = scmp.lt.s32.totalorder %s484_s11, 2 }
  0x11   : > { %s103_s22 = sand.u32 1, %s472_s8   ;;  %s303_s24 = smul.u32 48, %s480_s10 }
  0x12   : > { %s302_s23 = smul.u32 48, %s103_s22  ;;  %p311_p0 = pnand %p318_p13, %p541_p4 }
  0x13   : > { %s114_s27 = scalar_lea.hbm %s626_s0, %s303_s24  ;;  %p290_p1 = scmp.ge.s32.totalorder %s484_s11, 1 }
  0x14   : > { %s107_s28 = scalar_lea.vmem [#allocation2], %s302_s23  ;;  %s115_s30 = sshll.u32 %s114_s27, 4  ;;  %s116_s30 = int_to_ptr.hbm [resolvable:$true] %s115_s30 }
  0x15   : > { %s117_s29 = sshll.u32 %s107_s28, 4  ;;  %s104_s2 = scalar_lea.sflag [#allocation3], %s103_s22  ;;  %s118_s29 = int_to_ptr.vmem [resolvable:$true] %s117_s29 }
  0x16   : > { %s486_s3 = smov 128   ;;  %s487_s4 = smov 8  }
  0x17   : > { %313 = dma.hbm_to_vmem [thread:$0]  (!%p311_p0), %s116_s30, 768, %s118_s29, %s104_s2, %s486_s3, %s486_s3, %s487_s4  }
  0x18   : > { %p125_p2 = scmp.lt.s32.totalorder %s484_s11, 3 }
  0x1a   : > { %p126_p3 = pnand %p290_p1, %p125_p2 }
  0x1b   : > { %s574_s5 = sand.u32 (!%p126_p3), 1, %s468_s7  }
  0x1c   : > { %129 = sbr.rel (%p126_p3) target bundleno = 51 (0x33), region = 24  ;;  %s132_s13 = scalar_lea.sflag (!%p126_p3), [#allocation3], %s574_s5 }
  0x1d   : > { %s304_s12 = smul.u32 (!%p126_p3), 48, %s574_s5 }
  0x1f   : > { %s135_s15 = scalar_lea.vmem (!%p126_p3), [#allocation2], %s304_s12 }
  0x21   : > { %455 = dma.done.wait (%p547_p8), %s132_s13, 768  }
  0x22   : > { %457 = vsyncadd (%p547_p8), %s132_s13, 4294966528  ;;  %s305_s16 = smul.u32 48, %s476_s9  ;;  %v157_v0 = vld [vmem:[%s135_s15] sm:$0xff]  ;;  %vm161_vm0 = vcmask 130048   ;;  %v158_v1 = vld [vmem:[%s135_s15 + $0x8] sm:$0xff]  ;;  %s154_s24 = scalar_lea.vmem [#allocation5], %s304_s12 }
  0x23   : > { %v291_v2 = vld [vmem:[%s135_s15 + $0x10] sm:$0xff]  ;;  %v159_v3 = vadd.f32 -114.444, %v157_v0  ;;  %v160_v4 = vadd.f32 -114.444, %v158_v1  ;;  %s195_s25 = sshll.u32 %s154_s24, 4  ;;  %s196_s25 = int_to_ptr.vmem [resolvable:$true] %s195_s25 }
  0x24   : > { %s194_s23 = scalar_lea.hbm %s627_s1, %s305_s16  ;;  %v167_v5 = vadd.f32 -111.4605, %v291_v2  ;;  %v292_v6 = vld [vmem:[%s135_s15 + $0x18] sm:$0xff]  ;;  %v295_v7 = vld [vmem:[%s135_s15 + $0x20] sm:$0xff]  ;;  %v296_v8 = vld [vmem:[%s135_s15 + $0x28] sm:$0xff]  ;;  %s181_s18 = scalar_lea.sflag [#allocation4], %s574_s5 }
  0x25   : > { %162 = vst.msk [vmem:[%s154_s24] sm:$0xff] %vm161_vm0, %v159_v3  ;;  %v168_v9 = vadd.f32 -111.4605, %v292_v6  ;;  %v175_v10 = vadd.f32 -103.02, %v295_v7  ;;  %s197_s9 = sshll.u32 %s194_s23, 4  ;;  %s198_s9 = int_to_ptr.hbm [resolvable:$true] %s197_s9 }
  0x26   : > { %163 = vst.msk [vmem:[%s154_s24 + $0x8] sm:$0xff] %vm161_vm0, %v160_v4  ;;  %v176_v11 = vadd.f32 -103.02, %v296_v8  ;;  %s416_s26 = sshra.s32 %s198_s9, 4  ;;  %s422_s30 = scalar_lea.hbm %s627_s1, 96  ;;  %s417_s26 = int_to_ptr.hbm [resolvable:$true] %s416_s26 }
  0x27   : > { %293 = vst.msk [vmem:[%s154_s24 + $0x10] sm:$0xff] %vm161_vm0, %v167_v5  ;;  %s418_s27 = scalar_lea.hbm %s417_s26, 48  ;;  %p423_p7 = scmp.lt.s32.totalorder %s417_s26, %s627_s1 }
  0x28   : > { %294 = vst.msk [vmem:[%s154_s24 + $0x18] sm:$0xff] %vm161_vm0, %v168_v9  ;;  %p419_p4 = scmp.ne.s32.totalorder %s417_s26, %s418_s27  ;;  %p424_p8 = scmp.lt.s32.totalorder %s422_s30, %s418_s27 }
  0x29   : > { %297 = vst.msk [vmem:[%s154_s24 + $0x20] sm:$0xff] %vm161_vm0, %v175_v10 }
  0x2a   : > { %298 = vst.msk [vmem:[%s154_s24 + $0x28] sm:$0xff] %vm161_vm0, %v176_v11  ;;  %p420_p5 = pnand %p419_p4, %p551_p9  ;;  %p425_p10 = por %p424_p8, %p423_p7 }
  0x2c   : > { %p421_p6 = pneg %p420_p5 }
  0x2e   : > { %p426_p13 = pnand %p425_p10, %p421_p6 }
  0x30   : > { %429 = shalt.err (!%p426_p13)
}
  0x31   : > { %s488_s4 = smov 128   ;;  %s489_s5 = smov 8  }
  0x32   : > { %308 = dma.vmem_to_hbm [thread:$0]  (%p551_p9), %s196_s25, 768, %s198_s9, %s181_s18, %s488_s4, %s488_s4, %s489_s5  }
  0x33 PF: > { %s212_s12 = sand.u32 1, %s464_s6   ;;  %p315_p0 = pnand %p288_p12, %p558_p11 }
  0x34   : > { %s213_s13 = scalar_lea.sflag [#allocation4], %s212_s12 }
  0x35   : > { %p316_p1 = pneg %p315_p0 }
  0x37   : > { %459 = dma.done.wait (%p316_p1), %s213_s13, 768  }
  0x38   : > { %461 = vsyncadd (%p316_p1), %s213_s13, 4294966528  ;;  %s17_s11 = sadd.s32 1, %s484_s11   ;;  %s632_s6 = smov %s468_s7 }
  0x39   : > { %p14_p2 = scmp.ge.s32.totalorder %s17_s11, 4   ;;  %s633_s7 = smov %s472_s8 }
  0x3a   : > { %s634_s8 = smov %s556_s20  ;;  %s635_s9 = smov %s480_s10 }
  0x3b   : > { %s636_s10 = smov %s638_s14  ;;  %16 = sbr.rel (!%p14_p2) target bundleno = 6 (0x6), region = 73 }
  0x40   :  { %219 = vsyncpa [#allocation3], 1 }
  0x41   :  { %221 = vsyncpa [#allocation3 + $0x1], 1 }
  0x42   :  { %222 = vsyncpa [#allocation4], 1 }
  0x43   :  { %224 = vsyncpa [#allocation4 + $0x1], 1 }

</bundles_post_ra>
